<compile_context>
chip_gen: v7x
topology: tpu7x:2x2x1
jax: 0.10.0
libtpu: 0.0.40
codegen_flags: <defaults>
</compile_context>

<pallas_src>
import functools

import jax
import jax.numpy as jnp
from jax.experimental import pallas as pl
from jax.experimental.pallas import tpu as pltpu


def _round_up(n, m):
    return ((n + m - 1) // m) * m


def _choose_tiling(B, target_tb):
    """Pick (tb, B_pad, grid_steps) for the batch axis.

    - pad B to a multiple of 128 (lane width), never tile wider than that,
    - keep >=2 grid steps once the batch is big enough (v7x megacore sharding),
    - bound padding waste by shrinking tb toward ceil(B128 / nsteps)."""
    B128 = _round_up(max(B, 1), 128)
    min_steps = 2 if B128 >= 2 * 128 else 1
    nsteps = max(pl.cdiv(B128, target_tb), min_steps)
    tb = _round_up(pl.cdiv(B128, nsteps), 128)
    grid_steps = pl.cdiv(B128, tb)
    B_pad = grid_steps * tb
    return tb, B_pad, grid_steps


def tictactoe_kernel(x_ref, w1_ref, b1_ref, w2_ref, b2_ref, w3_ref, b3_ref,
                     out_ref):
    x = x_ref[...]                                                   # (9, TB) bf16

    # fc1 + ReLU   (MXU bf16 x bf16 -> f32 accumulate)
    h1 = jnp.dot(w1_ref[...], x, preferred_element_type=jnp.float32)  # (16, TB)
    h1 = jnp.maximum(h1 + b1_ref[...], 0.0)

    # fc2 + ReLU
    h2 = jnp.dot(w2_ref[...], h1.astype(jnp.bfloat16),
                 preferred_element_type=jnp.float32)                  # (16, TB)
    h2 = jnp.maximum(h2 + b2_ref[...], 0.0)

    # fc3 + Softmax over the feature axis (axis 0 in this layout)
    logits = jnp.dot(w3_ref[...], h2.astype(jnp.bfloat16),
                     preferred_element_type=jnp.float32)              # (9, TB)
    logits = logits + b3_ref[...]
    m = jnp.max(logits, axis=0, keepdims=True)                        # (1, TB)
    e = jnp.exp(logits - m)
    denom = jnp.sum(e, axis=0, keepdims=True)
    # approx reciprocal -> EUP slot (idle here); denom >= 1 after max-subtraction.
    out_ref[...] = (e * pl.reciprocal(denom, approx=True)).astype(out_ref.dtype)


def _pallas_forward_t(xT, params, tb):
    """Core call.  xT: (9, B_pad) bf16 with B_pad % tb == 0.  Returns (9, B_pad) bf16."""
    B_pad = xT.shape[1]
    grid = (B_pad // tb,)

    w1 = params["w1"].astype(jnp.bfloat16)                           # (16, 9)
    w2 = params["w2"].astype(jnp.bfloat16)                           # (16, 16)
    w3 = params["w3"].astype(jnp.bfloat16)                           # (9, 16)
    # Lane-tiled bias slabs (resident across grid steps; DMA'd once).
    b1 = jnp.broadcast_to(params["b1"].astype(jnp.float32)[:, None], (16, tb))
    b2 = jnp.broadcast_to(params["b2"].astype(jnp.float32)[:, None], (16, tb))
    b3 = jnp.broadcast_to(params["b3"].astype(jnp.float32)[:, None], (9, tb))

    const = lambda i: (0, 0)        # weights/biases resident across grid steps
    in_specs = [
        pl.BlockSpec((9, tb), lambda i: (0, i)),      # x^T batch block
        pl.BlockSpec((16, 9), const),
        pl.BlockSpec((16, tb), const),
        pl.BlockSpec((16, 16), const),
        pl.BlockSpec((16, tb), const),
        pl.BlockSpec((9, 16), const),
        pl.BlockSpec((9, tb), const),
    ]
    out_spec = pl.BlockSpec((9, tb), lambda i: (0, i))

    flops = 2 * B_pad * (9 * 16 + 16 * 16 + 16 * 9)
    bytes_accessed = (9 * B_pad * 2                        # x^T in  (bf16)
                      + 9 * B_pad * 2                      # probs out (bf16)
                      + (16 * 9 + 16 * 16 + 9 * 16) * 2    # weights (bf16)
                      + (16 + 16 + 9) * tb * 4)            # bias slabs (f32, once)
    cost = pl.CostEstimate(flops=flops,
                           transcendentals=B_pad * 10,
                           bytes_accessed=bytes_accessed)

    return pl.pallas_call(
        tictactoe_kernel,
        out_shape=jax.ShapeDtypeStruct((9, B_pad), jnp.bfloat16),
        grid=grid,
        in_specs=in_specs,
        out_specs=out_spec,
        compiler_params=pltpu.CompilerParams(
            dimension_semantics=("parallel",)),
        cost_estimate=cost,
    )(xT, w1, b1, w2, b2, w3, b3)


@functools.partial(jax.jit, static_argnames=("tb",))
def tictactoe_forward_transposed(xT, params, tb=8192):
    """Fast path with no wrapper transposes.

    xT: (9, B) board in feature-major layout (any float dtype).
    Returns (9, B) bf16 probabilities."""
    B = xT.shape[1]
    tb, B_pad, _ = _choose_tiling(B, tb)
    xTp = jnp.pad(xT.astype(jnp.bfloat16), ((0, 0), (0, B_pad - B)))
    outT = _pallas_forward_t(xTp, params, tb)
    return outT[:, :B]


@functools.partial(jax.jit, static_argnames=("tb",))
def tictactoe_forward(x, params, tb=8192):
    """Original module layout.  x: (B, 9) f32 -> (B, 9) f32 softmax probabilities.

    NOTE: the transpose/pad/cast passes here are layout plumbing outside the
    kernel; for end-to-end pipelines prefer tictactoe_forward_transposed."""
    B = x.shape[0]
    tb, B_pad, _ = _choose_tiling(B, tb)
    xT = jnp.pad(x.astype(jnp.bfloat16).T, ((0, 0), (0, B_pad - B)))   # (9, B_pad)
    outT = _pallas_forward_t(xT, params, tb)
    return outT[:, :B].T.astype(jnp.float32)                           # (B, 9)


def init_params(key):
    """nn.Linear default init: uniform in [-1/sqrt(fan_in), 1/sqrt(fan_in)]."""
    def linear(key, fan_in, fan_out):
        kw, kb = jax.random.split(key)
        bound = 1.0 / (fan_in ** 0.5)
        w = jax.random.uniform(kw, (fan_out, fan_in), jnp.float32, -bound, bound)
        b = jax.random.uniform(kb, (fan_out,), jnp.float32, -bound, bound)
        return w, b

    k1, k2, k3 = jax.random.split(key, 3)
    w1, b1 = linear(k1, 9, 16)
    w2, b2 = linear(k2, 16, 16)
    w3, b3 = linear(k3, 16, 9)
    return {"w1": w1, "b1": b1, "w2": w2, "b2": b2, "w3": w3, "b3": b3}


def reference_forward_f32(x, params):
    """Pure-f32 pure-JAX reference (original module semantics)."""
    h1 = jnp.maximum(x @ params["w1"].T + params["b1"], 0.0)
    h2 = jnp.maximum(h1 @ params["w2"].T + params["b2"], 0.0)
    logits = h2 @ params["w3"].T + params["b3"]
    return jax.nn.softmax(logits, axis=1)


def reference_forward_bf16(x, params):
    """Reference with the same bf16-in / f32-accumulate mixed precision."""
    xb = x.astype(jnp.bfloat16)
    w1 = params["w1"].astype(jnp.bfloat16)
    w2 = params["w2"].astype(jnp.bfloat16)
    w3 = params["w3"].astype(jnp.bfloat16)
    h1 = jnp.maximum(
        jnp.dot(xb, w1.T, preferred_element_type=jnp.float32) + params["b1"], 0.0)
    h2 = jnp.maximum(
        jnp.dot(h1.astype(jnp.bfloat16), w2.T,
                preferred_element_type=jnp.float32) + params["b2"], 0.0)
    logits = jnp.dot(h2.astype(jnp.bfloat16), w3.T,
                     preferred_element_type=jnp.float32) + params["b3"]
    return jax.nn.softmax(logits, axis=1)


if __name__ == "__main__":
    key = jax.random.PRNGKey(0)
    kp, kx = jax.random.split(key)
    params = init_params(kp)

    batch = 2
    # Board encoding: values in {-1, 0, 1}, 9 cells per sample (exact in bf16).
    x = jax.random.randint(kx, (batch, 9), -1, 2).astype(jnp.float32)

    out = tictactoe_forward(x, params)
    out = jax.block_until_ready(out)
    assert out.shape == (batch, 9)

    # Check vs a reference using the same mixed precision (bf16 out + approx rcp
    # mean the match is ~bf16-level, not exact).
    ref_bf16 = reference_forward_bf16(x, params)
    assert jnp.allclose(out, ref_bf16, atol=1e-2), "mismatch vs bf16 reference"

    # Sanity check vs the original full-f32 module semantics.
    ref_f32 = reference_forward_f32(x, params)
    assert jnp.allclose(out, ref_f32, atol=3e-2), "mismatch vs f32 reference"
    assert jnp.allclose(jnp.sum(out, axis=1), 1.0, atol=2e-2)

    # Exercise the transposed (no-wrapper-transpose) fast path too.
    outT = tictactoe_forward_transposed(x.T, params)
    outT = jax.block_until_ready(outT)
    assert outT.shape == (9, batch)
    assert jnp.allclose(outT.T.astype(jnp.float32), ref_bf16, atol=1e-2), \
        "transposed fast path mismatch"

    print("KERNEL_OK")
</pallas_src>

<mosaic_0001>
module attributes {stable_mosaic.version = 11 : i64} {
  func.func @tictactoe_kernel(%arg0: i32, %arg1: memref<9x128xbf16, #tpu.memory_space<vmem>>, %arg2: memref<16x9xbf16, #tpu.memory_space<vmem>>, %arg3: memref<16x128xf32, #tpu.memory_space<vmem>>, %arg4: memref<16x16xbf16, #tpu.memory_space<vmem>>, %arg5: memref<16x128xf32, #tpu.memory_space<vmem>>, %arg6: memref<9x16xbf16, #tpu.memory_space<vmem>>, %arg7: memref<9x128xf32, #tpu.memory_space<vmem>>, %arg8: memref<9x128xbf16, #tpu.memory_space<vmem>>) attributes {dimension_semantics = [#tpu.dimension_semantics<parallel>], iteration_bounds = array<i64: 1>, scalar_prefetch = 0 : i64, scratch_operands = 0 : i64, tpu.core_type = #tpu.core_type<tc>, window_params = [{transform_indices = @transform_0, window_bounds = array<i64: 9, 128>}, {pipeline_mode = #tpu.pipeline_mode<synchronous>, transform_indices = @transform_1, window_bounds = array<i64: 16, 9>}, {pipeline_mode = #tpu.pipeline_mode<synchronous>, transform_indices = @transform_2, window_bounds = array<i64: 16, 128>}, {pipeline_mode = #tpu.pipeline_mode<synchronous>, transform_indices = @transform_3, window_bounds = array<i64: 16, 16>}, {pipeline_mode = #tpu.pipeline_mode<synchronous>, transform_indices = @transform_4, window_bounds = array<i64: 16, 128>}, {pipeline_mode = #tpu.pipeline_mode<synchronous>, transform_indices = @transform_5, window_bounds = array<i64: 9, 16>}, {pipeline_mode = #tpu.pipeline_mode<synchronous>, transform_indices = @transform_6, window_bounds = array<i64: 9, 128>}, {transform_indices = @transform_7, window_bounds = array<i64: 9, 128>}]} {
    %c0 = arith.constant 0 : index
    %c0_0 = arith.constant 0 : index
    %0 = vector.load %arg1[%c0, %c0_0] : memref<9x128xbf16, #tpu.memory_space<vmem>>, vector<9x128xbf16>
    %c0_1 = arith.constant 0 : index
    %c0_2 = arith.constant 0 : index
    %1 = vector.load %arg2[%c0_1, %c0_2] : memref<16x9xbf16, #tpu.memory_space<vmem>>, vector<16x9xbf16>
    %cst = arith.constant dense<0.000000e+00> : vector<16x128xf32>
    %2 = tpu.matmul %1, %0, %cst {dimension_numbers = #tpu.dot_dimension_numbers<[1], [0], [0], [1], [0, 0, 1, 1], [], []>} : vector<16x9xbf16>, vector<9x128xbf16>, vector<16x128xf32> -> vector<16x128xf32>
    %c0_3 = arith.constant 0 : index
    %c0_4 = arith.constant 0 : index
    %3 = vector.load %arg3[%c0_3, %c0_4] : memref<16x128xf32, #tpu.memory_space<vmem>>, vector<16x128xf32>
    %4 = arith.addf %2, %3 : vector<16x128xf32>
    %cst_5 = arith.constant 0.000000e+00 : f32
    %5 = vector.broadcast %cst_5 : f32 to vector<16x128xf32>
    %6 = arith.maximumf %4, %5 : vector<16x128xf32>
    %c0_6 = arith.constant 0 : index
    %c0_7 = arith.constant 0 : index
    %7 = vector.load %arg4[%c0_6, %c0_7] : memref<16x16xbf16, #tpu.memory_space<vmem>>, vector<16x16xbf16>
    %8 = arith.truncf %6 : vector<16x128xf32> to vector<16x128xbf16>
    %cst_8 = arith.constant dense<0.000000e+00> : vector<16x128xf32>
    %9 = tpu.matmul %7, %8, %cst_8 {dimension_numbers = #tpu.dot_dimension_numbers<[1], [0], [0], [1], [0, 0, 1, 1], [], []>} : vector<16x16xbf16>, vector<16x128xbf16>, vector<16x128xf32> -> vector<16x128xf32>
    %c0_9 = arith.constant 0 : index
    %c0_10 = arith.constant 0 : index
    %10 = vector.load %arg5[%c0_9, %c0_10] : memref<16x128xf32, #tpu.memory_space<vmem>>, vector<16x128xf32>
    %11 = arith.addf %9, %10 : vector<16x128xf32>
    %cst_11 = arith.constant 0.000000e+00 : f32
    %12 = vector.broadcast %cst_11 : f32 to vector<16x128xf32>
    %13 = arith.maximumf %11, %12 : vector<16x128xf32>
    %c0_12 = arith.constant 0 : index
    %c0_13 = arith.constant 0 : index
    %14 = vector.load %arg6[%c0_12, %c0_13] : memref<9x16xbf16, #tpu.memory_space<vmem>>, vector<9x16xbf16>
    %15 = arith.truncf %13 : vector<16x128xf32> to vector<16x128xbf16>
    %cst_14 = arith.constant dense<0.000000e+00> : vector<9x128xf32>
    %16 = tpu.matmul %14, %15, %cst_14 {dimension_numbers = #tpu.dot_dimension_numbers<[1], [0], [0], [1], [0, 0, 1, 1], [], []>} : vector<9x16xbf16>, vector<16x128xbf16>, vector<9x128xf32> -> vector<9x128xf32>
    %c0_15 = arith.constant 0 : index
    %c0_16 = arith.constant 0 : index
    %17 = vector.load %arg7[%c0_15, %c0_16] : memref<9x128xf32, #tpu.memory_space<vmem>>, vector<9x128xf32>
    %18 = arith.addf %16, %17 : vector<9x128xf32>
    %cst_17 = arith.constant dense<0xFF800000> : vector<128xf32>
    %19 = vector.multi_reduction <maximumf>, %18, %cst_17 [0] : vector<9x128xf32> to vector<128xf32>
    %20 = vector.shape_cast %19 : vector<128xf32> to vector<1x128xf32>
    %21 = vector.broadcast %20 : vector<1x128xf32> to vector<9x128xf32>
    %22 = arith.subf %18, %21 : vector<9x128xf32>
    %23 = math.exp %22 : vector<9x128xf32>
    %cst_18 = arith.constant dense<0.000000e+00> : vector<128xf32>
    %24 = vector.multi_reduction <add>, %23, %cst_18 [0] : vector<9x128xf32> to vector<128xf32>
    %25 = vector.shape_cast %24 : vector<128xf32> to vector<1x128xf32>
    %26 = tpu.reciprocal %25 {approx = true} : vector<1x128xf32> -> vector<1x128xf32>
    %27 = vector.broadcast %26 : vector<1x128xf32> to vector<9x128xf32>
    %28 = arith.mulf %23, %27 : vector<9x128xf32>
    %29 = arith.truncf %28 : vector<9x128xf32> to vector<9x128xbf16>
    %c0_19 = arith.constant 0 : index
    %c0_20 = arith.constant 0 : index
    %30 = vector.load %arg8[%c0_19, %c0_20] : memref<9x128xbf16, #tpu.memory_space<vmem>>, vector<9x128xbf16>
    tpu.vector_store %arg8[%c0_19, %c0_20], %29 {strides = array<i32>} : memref<9x128xbf16, #tpu.memory_space<vmem>>, vector<9x128xbf16>,
    return
  }
  func.func @transform_0(%arg0: i32) -> (i32, i32) {
    %c0_i32 = arith.constant 0 : i32
    %c0_i32_0 = arith.constant 0 : i32
    return %c0_i32, %arg0 : i32, i32
  }
  func.func @transform_1(%arg0: i32) -> (i32, i32) {
    %c0_i32 = arith.constant 0 : i32
    %c0_i32_0 = arith.constant 0 : i32
    %c0_i32_1 = arith.constant 0 : i32
    return %c0_i32, %c0_i32_0 : i32, i32
  }
  func.func @transform_2(%arg0: i32) -> (i32, i32) {
    %c0_i32 = arith.constant 0 : i32
    %c0_i32_0 = arith.constant 0 : i32
    %c0_i32_1 = arith.constant 0 : i32
    return %c0_i32, %c0_i32_0 : i32, i32
  }
  func.func @transform_3(%arg0: i32) -> (i32, i32) {
    %c0_i32 = arith.constant 0 : i32
    %c0_i32_0 = arith.constant 0 : i32
    %c0_i32_1 = arith.constant 0 : i32
    return %c0_i32, %c0_i32_0 : i32, i32
  }
  func.func @transform_4(%arg0: i32) -> (i32, i32) {
    %c0_i32 = arith.constant 0 : i32
    %c0_i32_0 = arith.constant 0 : i32
    %c0_i32_1 = arith.constant 0 : i32
    return %c0_i32, %c0_i32_0 : i32, i32
  }
  func.func @transform_5(%arg0: i32) -> (i32, i32) {
    %c0_i32 = arith.constant 0 : i32
    %c0_i32_0 = arith.constant 0 : i32
    %c0_i32_1 = arith.constant 0 : i32
    return %c0_i32, %c0_i32_0 : i32, i32
  }
  func.func @transform_6(%arg0: i32) -> (i32, i32) {
    %c0_i32 = arith.constant 0 : i32
    %c0_i32_0 = arith.constant 0 : i32
    %c0_i32_1 = arith.constant 0 : i32
    return %c0_i32, %c0_i32_0 : i32, i32
  }
  func.func @transform_7(%arg0: i32) -> (i32, i32) {
    %c0_i32 = arith.constant 0 : i32
    %c0_i32_0 = arith.constant 0 : i32
    return %c0_i32, %arg0 : i32, i32
  }
}

</mosaic_0001>

<bundles_post_ra>
// kernel: tictactoe_forward.1
= control target key start
LH: loop header
LB: loop body
LE: loop exit
PB: predicated region body
PF: predicated region fallthrough
CT: control target
= control target key end

     0   :  { %vm47_vm0 = vcmask 1043456   ;;  %vm48_vm1 = vcmask 1044480   ;;  %v301_v0 = vmov 0.0   ;;  %v302_v2 = vmov 65535   ;;  %s388_s0 = inlined_call_operand.vmem [shape: bf16[9,128], index: 0, kind: input, shape index: {}]   ;;  %s389_s1 = inlined_call_operand.vmem [shape: bf16[16,9], index: 1, kind: input, shape index: {}]   ;;  %s390_s3 = inlined_call_operand.vmem [shape: bf16[16,16], index: 3, kind: input, shape index: {}]   ;;  %s391_s2 = inlined_call_operand.vmem [shape: f32[16,128], index: 2, kind: input, shape index: {}]   ;;  %s392_s5 = inlined_call_operand.vmem [shape: bf16[9,16], index: 5, kind: input, shape index: {}]   ;;  %s393_s4 = inlined_call_operand.vmem [shape: f32[16,128], index: 4, kind: input, shape index: {}]   ;;  %s394_s6 = inlined_call_operand.vmem [shape: f32[9,128], index: 6, kind: input, shape index: {}]   ;;  %s395_s7 = inlined_call_operand.vmem [shape: bf16[9,128], index: 7, kind: output, shape index: {}]  }
   0x1   :  { %270 = vmatprep.subr.bf16.mxu0 %v301_v0  ;;  %v291_v1 = vld [vmem:[%s388_s0] sm:$0x1f]   ;;  %276 = vmatprep.subr.bf16.mxu1 %v301_v0  ;;  %v49_v3 = vsel %vm47_vm0, 4294967295, %v302_v2  ;;  %vm303_vm2 = vmmov 0   ;;  %vm43_vm3 = vcmask 72704   ;;  %v32_v9 = vld [vmem:[%s391_s2 + $0x8] sm:$0xff] }
   0x2   :  { %v50_v4 = vsel %vm48_vm1, %v49_v3, 0  ;;  %272 = vmatprep.mubr.msk.bf16.mxu0 %vm303_vm2, %v301_v0  ;;  %278 = vmatprep.mubr.msk.bf16.mxu1 %vm303_vm2, %v301_v0  ;;  %v292_v6 = vld [vmem:[%s389_s1] sm:$0xff]   ;;  %vm107_vm4 = vcmask 130048   ;;  %v101_v21 = vld [vmem:[%s393_s4 + $0x8] sm:$0xff]  ;;  %vm208_vm5 = vcmask 1040384  }
   0x3   :  { %v52_v5 = vand.u32 %v291_v1, %v50_v4  ;;  %v31_v7 = vld [vmem:[%s391_s2] sm:$0xff]  ;;  %v158_v32 = vld [vmem:[%s394_s6 + $0x8] sm:$0x1]  ;;  %vm244_vm6 = vsmask.f32 256 }
   0x4   :  { %v293_v18 = vld [vmem:[%s390_s3] sm:$0xff]   ;;  %vm245_vm7 = vmand %vm208_vm5, %vm244_vm6 }
   0x5   :  { %271 = vmatpush3.bf16.msra.mxu0 %v52_v5  ;;  %v100_v19 = vld [vmem:[%s393_s4] sm:$0xff] }
   0x6   :  { %282 = vmatprep.subr.bf16.mxu0 %v301_v0  ;;  %v294_v30 = vld [vmem:[%s392_s5] sm:$0x1f]  }
   0x7   :  { %v157_v33 = vld [vmem:[%s394_s6] sm:$0xff] }
   0x8   :  { %273 = vmatmul.mubr.msk.bf16.vlgmr.msra.gmra.mrb[0].mxu0 %vm43_vm3, %v292_v6 }
   0x9   :  { %284 = vmatprep.mubr.msk.bf16.mxu0 %vm303_vm2, %v301_v0  ;;  %v246_v0 = vld [vmem:[%s395_s7 + $0x4] sm:$0x1] }
  0xdb   :  { %v88_v8 = vpop.f32.mrb[0].mxu0 }
  0xdc   :  { %v89_v10 = vadd.f32 %v88_v8, %v31_v7  ;;  %v274_v11 = vpop.f32.mrb[1].mxu0 }
  0xdd   :  { %v91_v12 = vpop.f32.mrb[2].mxu0 }
  0xde   :  { %v92_v13 = vadd.f32 %v91_v12, %v32_v9  ;;  %v275_v14 = vpop.f32.mrb[3].mxu0  ;;  %v95_v15 = vmax.f32 %v89_v10, 0.0 }
  0xe0   :  { %v96_v16 = vmax.f32 %v92_v13, 0.0 }
  0xe2   :  { %v99_v17 = vpack.c.bf16 %v96_v16, %v95_v15 }
  0xe4   :  { %277 = vmatpush3.bf16.msra.mxu1 %v99_v17 }
  0xe7   :  { %279 = vmatmul.mubr.msk.bf16.vlgmr.msra.gmra.mrb[0].mxu1 %vm107_vm4, %v293_v18 }
 0x1ba   :  { %v145_v20 = vpop.f32.mrb[0].mxu1 }
 0x1bb   :  { %v146_v22 = vadd.f32 %v145_v20, %v100_v19  ;;  %v280_v23 = vpop.f32.mrb[1].mxu1 }
 0x1bc   :  { %v148_v24 = vpop.f32.mrb[2].mxu1 }
 0x1bd   :  { %v149_v25 = vadd.f32 %v148_v24, %v101_v21  ;;  %v281_v26 = vpop.f32.mrb[3].mxu1  ;;  %v152_v27 = vmax.f32 %v146_v22, 0.0 }
 0x1bf   :  { %v153_v28 = vmax.f32 %v149_v25, 0.0 }
 0x1c1   :  { %v156_v29 = vpack.c.bf16 %v153_v28, %v152_v27 }
 0x1c3   :  { %283 = vmatpush3.bf16.msra.mxu0 %v156_v29 }
 0x1c6   :  { %285 = vmatmul.mubr.msk.bf16.vlgmr.msra.gmra.mrb[4].mxu0 %vm107_vm4, %v294_v30 }
 0x299   :  { %v201_v31 = vpop.f32.mrb[4].mxu0 }
 0x29a   :  { %v286_v34 = vpop.f32.mrb[5].mxu0  ;;  %v202_v38 = vadd.f32 %v201_v31, %v157_v33 }
 0x29b   :  { %v204_v35 = vpop.f32.mrb[6].mxu0 }
 0x29c   :  { %v205_v36 = vadd.f32 %v204_v35, %v158_v32  ;;  %v287_v37 = vpop.f32.mrb[7].mxu0 }
 0x29e   :  { %v209_v39 = vsel %vm208_vm5, %v205_v36, -inf }
 0x29f   :  { %v210_v40 = vmax.f32 %v202_v38, %v209_v39 }
 0x2a1   :  { %v211_v41 = vrot.slane %v210_v40, 4 }
 0x2a3   :  { %v212_v42 = vmax.f32 %v210_v40, %v211_v41 }
 0x2a5   :  { %v213_v43 = vrot.slane %v212_v42, 2 }
 0x2a7   :  { %v214_v44 = vmax.f32 %v212_v42, %v213_v43 }
 0x2a9   :  { %v215_v45 = vrot.slane %v214_v44, 1 }
 0x2ab   :  { %v216_v46 = vmax.f32 %v214_v44, %v215_v45 }
 0x2ad   :  { %v217_v47 = vsub.f32 %v202_v38, %v216_v46  ;;  %v218_v48 = vsub.f32 %v205_v36, %v216_v46 }
 0x2af   :  { %v219_v49 = vmul.f32 1.442695, %v217_v47  ;;  %v221_v50 = vmul.f32 1.442695, %v218_v48 }
 0x2b1   :  { %295 = vpow2.f32 %v219_v49 }
 0x2b2   :  { %297 = vpow2.f32 %v221_v50 }
 0x2bb   :  { %v296_v51 = vpop.eup %295 }
 0x2bc   :  { %v298_v52 = vpop.eup %297 }
 0x2bd   :  { %v223_v53 = vsel %vm208_vm5, %v298_v52, 0.0 }
 0x2be   :  { %v224_v54 = vadd.f32 %v296_v51, %v223_v53 }
 0x2c0   :  { %v225_v55 = vrot.slane %v224_v54, 4 }
 0x2c2   :  { %v226_v56 = vadd.f32 %v225_v55, %v224_v54 }
 0x2c4   :  { %v227_v57 = vrot.slane %v226_v56, 2 }
 0x2c6   :  { %v228_v58 = vadd.f32 %v227_v57, %v226_v56 }
 0x2c8   :  { %v229_v59 = vrot.slane %v228_v58, 1 }
 0x2ca   :  { %v230_v60 = vadd.f32 %v229_v59, %v228_v58 }
 0x2cc   :  { %299 = vrcp.f32 %v230_v60 }
 0x2d6   :  { %v300_v61 = vpop.eup %299 }
 0x2d7   :  { %v232_v62 = vmul.f32 %v300_v61, %v296_v51  ;;  %v233_v63 = vmul.f32 %v300_v61, %v298_v52 }
 0x2d9   :  { %v262_v1 = vpack.c.bf16 %v232_v62, %v232_v62  ;;  %v263_v2 = vpack.c.bf16 %v233_v63, %v233_v63 }
 0x2db   :  { %242 = vst [vmem:[%s395_s7] sm:$0xf] %v262_v1  ;;  %v247_v3 = vsel %vm245_vm7, %v263_v2, %v246_v0 }
 0x2dc   :  { %248 = vst [vmem:[%s395_s7 + $0x4] sm:$0x1] %v247_v3 }

</bundles_post_ra>
